<compile_context>
chip_gen: v5e
topology: v5e:2x2
jax: 0.10.0
libtpu: 0.0.40
codegen_flags: <defaults>
</compile_context>

<pallas_src>
import jax
import jax.numpy as jnp
from jax.experimental import pallas as pl
from jax.experimental.pallas import tpu as pltpu


def _round_up(x, m):
    return ((x + m - 1) // m) * m


# ---------------------------------------------------------------------------
# Pallas kernel
# ---------------------------------------------------------------------------
def _asr_head_kernel(x_ref, w1_ref, b1_ref, w2_ref, b2_ref, out_ref, h_ref):
    v_idx = pl.program_id(1)

    @pl.when(v_idx == 0)
    def _():
        # bf16 operands straight into the MXU, f32 accumulation.
        h = jnp.dot(x_ref[...], w1_ref[...], preferred_element_type=jnp.float32)
        h = jnp.maximum(h + b1_ref[...], 0.0)          # bias + ReLU on the VPU
        h_ref[...] = h.astype(h_ref.dtype)             # bf16 scratch, reused over v

    logits = jnp.dot(h_ref[...], w2_ref[...], preferred_element_type=jnp.float32)
    out_ref[...] = (logits + b2_ref[...]).astype(out_ref.dtype)


def asr_head_pallas(x_flat, w1, b1, w2, b2, *, tm=512, tn=512):
    """x_flat: [BT, F] -> logits [BT, V] (bf16), tiled Pallas call."""
    BT, F = x_flat.shape
    H = w1.shape[1]
    V = w2.shape[1]

    # Pad every matmul dim to a multiple of 128 (full MXU tiles, lane-dense
    # unmasked stores).  Zero padding is exact for this computation.
    Fp = _round_up(F, 128)
    Hp = _round_up(H, 128)
    tn = min(tn, _round_up(V, 128))
    Vp = _round_up(_round_up(V, 128), tn)

    # Row tile: multiple of 16 (bf16 sublane packing).  512-row tiles reach
    # ~85% of HBM roofline on v5e/v6e and, double-buffered, still fit well
    # inside v7x's 64 MiB VMEM.
    tm = min(tm, _round_up(BT, 16))
    BTp = _round_up(BT, tm)

    x_p = jnp.zeros((BTp, Fp), jnp.bfloat16).at[:BT, :F].set(
        x_flat.astype(jnp.bfloat16))
    w1_p = jnp.zeros((Fp, Hp), jnp.bfloat16).at[:F, :H].set(
        w1.astype(jnp.bfloat16))
    b1_p = jnp.zeros((1, Hp), jnp.float32).at[:, :H].set(b1.astype(jnp.float32))
    w2_p = jnp.zeros((Hp, Vp), jnp.bfloat16).at[:H, :V].set(
        w2.astype(jnp.bfloat16))
    b2_p = jnp.zeros((1, Vp), jnp.float32).at[:, :V].set(b2.astype(jnp.float32))

    grid = (BTp // tm, Vp // tn)

    flops = 2 * BTp * (Fp * Hp + Hp * Vp)
    bytes_accessed = (x_p.size * 2 + w1_p.size * 2 + w2_p.size * 2
                      + b1_p.size * 4 + b2_p.size * 4 + BTp * Vp * 2)

    out = pl.pallas_call(
        _asr_head_kernel,
        out_shape=jax.ShapeDtypeStruct((BTp, Vp), jnp.bfloat16),
        grid=grid,
        in_specs=[
            pl.BlockSpec((tm, Fp), lambda i, v: (i, 0)),   # x: reused across v
            pl.BlockSpec((Fp, Hp), lambda i, v: (0, 0)),   # W1: VMEM-resident
            pl.BlockSpec((1, Hp), lambda i, v: (0, 0)),    # b1: VMEM-resident
            pl.BlockSpec((Hp, tn), lambda i, v: (0, v)),   # W2: tiled over vocab
            pl.BlockSpec((1, tn), lambda i, v: (0, v)),    # b2: tiled over vocab
        ],
        out_specs=pl.BlockSpec((tm, tn), lambda i, v: (i, v)),
        scratch_shapes=[pltpu.VMEM((tm, Hp), jnp.bfloat16)],
        compiler_params=pltpu.CompilerParams(
            # Row axis is embarrassingly parallel (2 TCs on v7x); vocab axis
            # stays sequential per row tile so the h scratch is valid.
            dimension_semantics=("parallel", "arbitrary"),
            vmem_limit_bytes=48 * 1024 * 1024,
        ),
        cost_estimate=pl.CostEstimate(
            flops=flops, transcendentals=0, bytes_accessed=bytes_accessed),
    )(x_p, w1_p, b1_p, w2_p, b2_p)

    return out[:BT, :V]


# ---------------------------------------------------------------------------
# Synthetic inner ASR model (the thing CPUWrapperASR wraps)
# ---------------------------------------------------------------------------
class SyntheticASRModel:
    """Tiny encoder head: [B,T,F] features -> [B,T,V] logits (Pallas kernel)."""

    def __init__(self, n_feat, n_hidden, n_vocab, key):
        k1, k2, k3, k4 = jax.random.split(key, 4)
        # Weights kept in bf16 (MXU-native); biases in f32.
        self.w1 = (jax.random.normal(k1, (n_feat, n_hidden), jnp.float32)
                   * 0.05).astype(jnp.bfloat16)
        self.b1 = jax.random.normal(k2, (1, n_hidden), jnp.float32) * 0.01
        self.w2 = (jax.random.normal(k3, (n_hidden, n_vocab), jnp.float32)
                   * 0.05).astype(jnp.bfloat16)
        self.b2 = jax.random.normal(k4, (1, n_vocab), jnp.float32) * 0.01

    def __call__(self, batch, task, is_eval=False, teacher=None, teacher_lm=None):
        x = batch["xs"]
        B, T, F = x.shape
        logits = asr_head_pallas(
            x.reshape(B * T, F), self.w1, self.b1, self.w2, self.b2)
        return logits.reshape(B, T, -1)


# ---------------------------------------------------------------------------
# CPUWrapperASR: exact wrapper semantics — pure delegation, no extra compute.
# ---------------------------------------------------------------------------
class CPUWrapperASR:
    def __init__(self, model):
        self.module = model

    def forward(self, batch, task, is_eval=False, teacher=None, teacher_lm=None):
        # TODO(synk): DataParallel / DDP scatter-gather machinery from the
        # original file has no compute and no Pallas equivalent; forward is
        # pure delegation.
        return self.module(batch, task, is_eval, teacher, teacher_lm)

    __call__ = forward


if __name__ == "__main__":
    key = jax.random.PRNGKey(0)
    k_x, k_p = jax.random.split(key)

    B, T, F, H, V = 2, 8, 32, 32, 16
    xs = jax.random.normal(k_x, (B, T, F), jnp.float32)
    batch = {"xs": xs}

    model = SyntheticASRModel(n_feat=F, n_hidden=H, n_vocab=V, key=k_p)
    wrapper = CPUWrapperASR(model)

    out = wrapper(batch, task="ys", is_eval=True)
    out = jax.block_until_ready(out)

    # Plain-JAX reference of the same bf16-in / f32-accumulate forward.
    xb = xs.reshape(B * T, F).astype(jnp.bfloat16).astype(jnp.float32)
    h = jnp.maximum(xb @ model.w1.astype(jnp.float32) + model.b1, 0.0)
    h = h.astype(jnp.bfloat16).astype(jnp.float32)
    ref = h @ model.w2.astype(jnp.float32) + model.b2
    ref = ref.astype(jnp.bfloat16).astype(jnp.float32).reshape(B, T, V)

    assert out.shape == (B, T, V)
    assert out.dtype == jnp.bfloat16
    assert jnp.allclose(out.astype(jnp.float32), ref, atol=2e-2, rtol=2e-2)

    print("KERNEL_OK")
</pallas_src>

<mosaic_0001>
module attributes {stable_mosaic.version = 11 : i64} {
  func.func @_asr_head_kernel(%arg0: i32, %arg1: i32, %arg2: memref<16x128xbf16, #tpu.memory_space<vmem>>, %arg3: memref<128x128xbf16, #tpu.memory_space<vmem>>, %arg4: memref<1x128xf32, #tpu.memory_space<vmem>>, %arg5: memref<128x128xbf16, #tpu.memory_space<vmem>>, %arg6: memref<1x128xf32, #tpu.memory_space<vmem>>, %arg7: memref<16x128xbf16, #tpu.memory_space<vmem>>, %arg8: memref<16x128xbf16, #tpu.memory_space<vmem>>) attributes {dimension_semantics = [#tpu.dimension_semantics<parallel>, #tpu.dimension_semantics<arbitrary>], iteration_bounds = array<i64: 1, 1>, scalar_prefetch = 0 : i64, scratch_operands = 1 : i64, tpu.core_type = #tpu.core_type<tc>, window_params = [{transform_indices = @transform_0, window_bounds = array<i64: 16, 128>}, {pipeline_mode = #tpu.pipeline_mode<synchronous>, transform_indices = @transform_1, window_bounds = array<i64: 128, 128>}, {pipeline_mode = #tpu.pipeline_mode<synchronous>, transform_indices = @transform_2, window_bounds = array<i64: 1, 128>}, {transform_indices = @transform_3, window_bounds = array<i64: 128, 128>}, {transform_indices = @transform_4, window_bounds = array<i64: 1, 128>}, {transform_indices = @transform_5, window_bounds = array<i64: 16, 128>}]} {
    %c0_i32 = arith.constant 0 : i32
    %0 = arith.cmpi eq, %arg1, %c0_i32 : i32
    %1 = arith.extui %0 : i1 to i32
    %c0_i32_0 = arith.constant 0 : i32
    %2 = arith.cmpi ne, %1, %c0_i32_0 : i32
    scf.if %2 {
      %c0_8 = arith.constant 0 : index
      %c0_9 = arith.constant 0 : index
      %11 = vector.load %arg2[%c0_8, %c0_9] : memref<16x128xbf16, #tpu.memory_space<vmem>>, vector<16x128xbf16>
      %c0_10 = arith.constant 0 : index
      %c0_11 = arith.constant 0 : index
      %12 = vector.load %arg3[%c0_10, %c0_11] : memref<128x128xbf16, #tpu.memory_space<vmem>>, vector<128x128xbf16>
      %cst_12 = arith.constant dense<0.000000e+00> : vector<16x128xf32>
      %13 = tpu.matmul %11, %12, %cst_12 {dimension_numbers = #tpu.dot_dimension_numbers<[1], [0], [0], [1], [0, 0, 1, 1], [], []>} : vector<16x128xbf16>, vector<128x128xbf16>, vector<16x128xf32> -> vector<16x128xf32>
      %c0_13 = arith.constant 0 : index
      %c0_14 = arith.constant 0 : index
      %14 = vector.load %arg4[%c0_13, %c0_14] : memref<1x128xf32, #tpu.memory_space<vmem>>, vector<1x128xf32>
      %15 = vector.broadcast %14 : vector<1x128xf32> to vector<16x128xf32>
      %16 = arith.addf %13, %15 : vector<16x128xf32>
      %cst_15 = arith.constant 0.000000e+00 : f32
      %17 = vector.broadcast %cst_15 : f32 to vector<16x128xf32>
      %18 = arith.maximumf %16, %17 : vector<16x128xf32>
      %19 = arith.truncf %18 : vector<16x128xf32> to vector<16x128xbf16>
      %c0_16 = arith.constant 0 : index
      %c0_17 = arith.constant 0 : index
      %20 = vector.load %arg8[%c0_16, %c0_17] : memref<16x128xbf16, #tpu.memory_space<vmem>>, vector<16x128xbf16>
      tpu.vector_store %arg8[%c0_16, %c0_17], %19 {strides = array<i32>} : memref<16x128xbf16, #tpu.memory_space<vmem>>, vector<16x128xbf16>,
    } else {
    }
    %c0 = arith.constant 0 : index
    %c0_1 = arith.constant 0 : index
    %3 = vector.load %arg8[%c0, %c0_1] : memref<16x128xbf16, #tpu.memory_space<vmem>>, vector<16x128xbf16>
    %c0_2 = arith.constant 0 : index
    %c0_3 = arith.constant 0 : index
    %4 = vector.load %arg5[%c0_2, %c0_3] : memref<128x128xbf16, #tpu.memory_space<vmem>>, vector<128x128xbf16>
    %cst = arith.constant dense<0.000000e+00> : vector<16x128xf32>
    %5 = tpu.matmul %3, %4, %cst {dimension_numbers = #tpu.dot_dimension_numbers<[1], [0], [0], [1], [0, 0, 1, 1], [], []>} : vector<16x128xbf16>, vector<128x128xbf16>, vector<16x128xf32> -> vector<16x128xf32>
    %c0_4 = arith.constant 0 : index
    %c0_5 = arith.constant 0 : index
    %6 = vector.load %arg6[%c0_4, %c0_5] : memref<1x128xf32, #tpu.memory_space<vmem>>, vector<1x128xf32>
    %7 = vector.broadcast %6 : vector<1x128xf32> to vector<16x128xf32>
    %8 = arith.addf %5, %7 : vector<16x128xf32>
    %9 = arith.truncf %8 : vector<16x128xf32> to vector<16x128xbf16>
    %c0_6 = arith.constant 0 : index
    %c0_7 = arith.constant 0 : index
    %10 = vector.load %arg7[%c0_6, %c0_7] : memref<16x128xbf16, #tpu.memory_space<vmem>>, vector<16x128xbf16>
    tpu.vector_store %arg7[%c0_6, %c0_7], %9 {strides = array<i32>} : memref<16x128xbf16, #tpu.memory_space<vmem>>, vector<16x128xbf16>,
    return
  }
  func.func @transform_0(%arg0: i32, %arg1: i32) -> (i32, i32) {
    %c0_i32 = arith.constant 0 : i32
    %c0_i32_0 = arith.constant 0 : i32
    return %arg0, %c0_i32 : i32, i32
  }
  func.func @transform_1(%arg0: i32, %arg1: i32) -> (i32, i32) {
    %c0_i32 = arith.constant 0 : i32
    %c0_i32_0 = arith.constant 0 : i32
    %c0_i32_1 = arith.constant 0 : i32
    return %c0_i32, %c0_i32_0 : i32, i32
  }
  func.func @transform_2(%arg0: i32, %arg1: i32) -> (i32, i32) {
    %c0_i32 = arith.constant 0 : i32
    %c0_i32_0 = arith.constant 0 : i32
    %c0_i32_1 = arith.constant 0 : i32
    return %c0_i32, %c0_i32_0 : i32, i32
  }
  func.func @transform_3(%arg0: i32, %arg1: i32) -> (i32, i32) {
    %c0_i32 = arith.constant 0 : i32
    %c0_i32_0 = arith.constant 0 : i32
    return %c0_i32, %arg1 : i32, i32
  }
  func.func @transform_4(%arg0: i32, %arg1: i32) -> (i32, i32) {
    %c0_i32 = arith.constant 0 : i32
    %c0_i32_0 = arith.constant 0 : i32
    return %c0_i32, %arg1 : i32, i32
  }
  func.func @transform_5(%arg0: i32, %arg1: i32) -> (i32, i32) {
    %c0_i32 = arith.constant 0 : i32
    return %arg0, %arg1 : i32, i32
  }
}

</mosaic_0001>

<bundles_post_ra>
// kernel: tpu_custom_call.1
= control target key start
LH: loop header
LB: loop body
LE: loop exit
PB: predicated region body
PF: predicated region fallthrough
CT: control target
= control target key end

     0   :  { %10 = vsyncpa [#allocation4], 0  ;;  %s558_s0 = inlined_call_operand.hbm [shape: bf16[16,128], index: 0, kind: input, shape index: {}]   ;;  %s559_s1 = inlined_call_operand.hbm [shape: bf16[128,128], index: 1, kind: input, shape index: {}]   ;;  %s560_s2 = inlined_call_operand.vmem [shape: f32[1,128], index: 2, kind: input, shape index: {}]   ;;  %s561_s3 = inlined_call_operand.hbm [shape: bf16[128,128], index: 3, kind: input, shape index: {}]   ;;  %s562_s4 = inlined_call_operand.vmem [shape: f32[1,128], index: 4, kind: input, shape index: {}]   ;;  %s563_s5 = inlined_call_operand.hbm [shape: bf16[16,128], index: 5, kind: output, shape index: {}]  }
   0x1   :  { %11 = vsyncpa [#allocation7], 0 }
   0x2   :  { %12 = vsyncpa [#allocation5], 0  ;;  %s30_s20 = sshll.u32 %s559_s1, 4  ;;  %s492_s21 = smov [#allocation6]   ;;  %s31_s20 = int_to_ptr.hbm [resolvable:$true] %s30_s20 }
   0x3   :  { %s32_s22 = sshll.u32 %s492_s21, 4  ;;  %s17_s25 = sshll.u32 %s558_s0, 4  ;;  %s33_s22 = int_to_ptr.vmem [resolvable:$true] %s32_s22  ;;  %s18_s25 = int_to_ptr.hbm [resolvable:$true] %s17_s25 }
   0x4   :  { %s493_s26 = smov 64   ;;  %s494_s27 = smov 4  }
   0x5   :  { %38 = dma.hbm_to_vmem [thread:$0]  %s31_s20, 1024, %s33_s22, [#allocation7], %s493_s26, %s493_s26, %s494_s27  }
   0x6   :  { %s495_s28 = smov [#allocation3]   ;;  %s45_s1 = sshll.u32 %s561_s3, 4  ;;  %s46_s1 = int_to_ptr.hbm [resolvable:$true] %s45_s1 }
   0x7   :  { %s19_s29 = sshll.u32 %s495_s28, 4  ;;  %s496_s0 = smov [#allocation8]   ;;  %s20_s29 = int_to_ptr.vmem [resolvable:$true] %s19_s29 }
   0x8   :  { %25 = dma.hbm_to_vmem [thread:$0]  %s18_s25, 128, %s20_s29, [#allocation4], %s493_s26, %s493_s26, %s494_s27  }
   0x9   :  { %s47_s7 = sshll.u32 %s496_s0, 4  ;;  %s48_s7 = int_to_ptr.vmem [resolvable:$true] %s47_s7 }
   0xa   :  { %53 = dma.hbm_to_vmem [thread:$0]  %s46_s1, 1024, %s48_s7, [#allocation7], %s493_s26, %s493_s26, %s494_s27  }
   0xb   :  { %486 = dma.done.wait [#allocation4], 128  }
   0xc   :  { %487 = vsyncadd [#allocation4], 4294967168 }
   0xd   :  { %488 = dma.done.wait [#allocation7], 2048  }
   0xe   :  { %489 = vsyncadd [#allocation7], 4294965248  ;;  %v362_v0 = vld [vmem:[#allocation6 + $0x38] sm:$0xff]  ;;  %v361_v1 = vld [vmem:[#allocation6 + $0x30] sm:$0xff]  ;;  %s497_s11 = smov [#allocation9]  }
   0xf   :  { %148 = vmatpush.bf16.msra.mxu0 %v362_v0  ;;  %v371_v2 = vld [vmem:[#allocation8 + $0x38] sm:$0xff]  ;;  %v370_v3 = vld [vmem:[#allocation8 + $0x30] sm:$0xff]  ;;  %v360_v4 = vld [vmem:[#allocation6 + $0x28] sm:$0xff]  ;;  %s266_s12 = sshll.u32 %s497_s11, 4  ;;  %s267_s12 = int_to_ptr.vmem [resolvable:$true] %s266_s12 }
  0x10   :  { %244 = vmatpush.bf16.msra.mxu1 %v371_v2  ;;  %v359_v5 = vld [vmem:[#allocation6 + $0x20] sm:$0xff]  ;;  %v358_v6 = vld [vmem:[#allocation6 + $0x18] sm:$0xff]  ;;  %v357_v7 = vld [vmem:[#allocation6 + $0x10] sm:$0xff] }
  0x11   :  { %v356_v8 = vld [vmem:[#allocation6 + $0x8] sm:$0xff]  ;;  %v355_v9 = vld [vmem:[#allocation6] sm:$0xff]  ;;  %v354_v10 = vld [vmem:[#allocation3] sm:$0xff] }
  0x12   :  { %v369_v11 = vld [vmem:[#allocation8 + $0x28] sm:$0xff]  ;;  %v368_v12 = vld [vmem:[#allocation8 + $0x20] sm:$0xff]  ;;  %v367_v13 = vld [vmem:[#allocation8 + $0x18] sm:$0xff] }
  0x13   :  { %149 = vmatpush.bf16.msra.mxu0 %v361_v1  ;;  %v366_v14 = vld [vmem:[#allocation8 + $0x10] sm:$0xff]  ;;  %v365_v15 = vld [vmem:[#allocation8 + $0x8] sm:$0xff]  ;;  %v364_v16 = vld [vmem:[#allocation8] sm:$0xff] }
  0x14   :  { %245 = vmatpush.bf16.msra.mxu1 %v370_v3  ;;  %v388_v18 = vld [vmem:[%s560_s2] ss:$0 sm:$0xff]  ;;  %s268_s2 = sshll.u32 %s563_s5, 4  ;;  %s269_s2 = int_to_ptr.hbm [resolvable:$true] %s268_s2 }
  0x15   :  { %v389_v27 = vld [vmem:[%s562_s4] ss:$0 sm:$0xff] }
  0x17   :  { %150 = vmatpush.bf16.msra.mxu0 %v360_v4 }
  0x18   :  { %246 = vmatpush.bf16.msra.mxu1 %v369_v11 }
  0x1b   :  { %151 = vmatpush.bf16.msra.mxu0 %v359_v5 }
  0x1c   :  { %247 = vmatpush.bf16.msra.mxu1 %v368_v12 }
  0x1f   :  { %152 = vmatpush.bf16.msra.mxu0 %v358_v6 }
  0x20   :  { %248 = vmatpush.bf16.msra.mxu1 %v367_v13 }
  0x23   :  { %153 = vmatpush.bf16.msra.mxu0 %v357_v7 }
  0x24   :  { %249 = vmatpush.bf16.msra.mxu1 %v366_v14 }
  0x27   :  { %154 = vmatpush.bf16.msra.mxu0 %v356_v8 }
  0x28   :  { %250 = vmatpush.bf16.msra.mxu1 %v365_v15 }
  0x2b   :  { %155 = vmatpush.bf16.msra.mxu0 %v355_v9 }
  0x2c   :  { %251 = vmatpush.bf16.msra.mxu1 %v364_v16 }
  0x2e   :  { %156 = vmatmul.bf16.vlgmr.msra.gmra.mxu0 %v354_v10 }
  0xab   :  { %v157_v17 = vpop.f32.mrf.mxu0 }
  0xac   :  { %v158_v19 = vadd.f32 %v388_v18, %v157_v17 }
  0xae   :  { %v162_v22 = vmax.f32 %v158_v19, 0.0 }
  0xb3   :  { %v159_v20 = vpop.f32.mrf.mxu0 }
  0xb4   :  { %v160_v21 = vadd.f32 %v388_v18, %v159_v20 }
  0xb6   :  { %v163_v23 = vmax.f32 %v160_v21, 0.0 }
  0xb8   :  { %v375_v24 = vpack.c.bf16 %v163_v23, %v162_v22 }
  0xba   :  { %376 = vst [vmem:[#allocation2] sm:$0xff] %v375_v24  }
  0xc1   :  { %v363_v25 = vld [vmem:[#allocation2] sm:$0xff] }
  0xc2   :  { %252 = vmatmul.bf16.vlgmr.msra.gmra.mxu1 %v363_v25 }
 0x13f   :  { %v253_v26 = vpop.f32.mrf.mxu1 }
 0x140   :  { %v254_v29 = vadd.f32 %v389_v27, %v253_v26 }
 0x147   :  { %v255_v28 = vpop.f32.mrf.mxu1 }
 0x148   :  { %v256_v30 = vadd.f32 %v389_v27, %v255_v28 }
 0x14a   :  { %v380_v31 = vpack.c.bf16 %v256_v30, %v254_v29 }
 0x14c   :  { %381 = vst [vmem:[#allocation9] sm:$0xff] %v380_v31  }
 0x14d   :  { %274 = dma.vmem_to_hbm [thread:$0]  %s267_s12, 128, %s269_s2, [#allocation5], %s493_s26, %s493_s26, %s494_s27  }
 0x14e   :  { %490 = dma.done.wait [#allocation5], 128  }
 0x14f   :  { %491 = vsyncadd [#allocation5], 4294967168 }
 0x150   :  { %279 = vsyncpa [#allocation4], 1 }
 0x151   :  { %280 = vsyncpa [#allocation7], 1 }
 0x152   :  { %281 = vsyncpa [#allocation5], 1 }

</bundles_post_ra>
